<compile_context>
chip_gen: v7x
topology: tpu7x:2x2x1
jax: 0.10.0
libtpu: 0.0.40
codegen_flags: <defaults>
</compile_context>

<pallas_src>
import functools

import jax
import jax.numpy as jnp
from jax import lax
from jax.experimental import pallas as pl
from jax.experimental.pallas import tpu as pltpu


# --------------------------------------------------------------------------- #
# Generation-aware VMEM budget & tile selection                                #
# --------------------------------------------------------------------------- #
def _vmem_limit_bytes() -> int:
    """Scoped-VMEM budget derived from the actual chip (v5e/v6e: 128 MiB, v7x: 64 MiB)."""
    try:
        cap = int(pltpu.get_tpu_info().vmem_capacity_bytes)
    except Exception:  # pragma: no cover - conservative fallback
        cap = 64 * 1024 * 1024
    return max(32 * 1024 * 1024, min(cap * 3 // 4, 112 * 1024 * 1024))


def _choose_tile_t(T: int, c_in: int, c_out: int, itemsize: int, vmem_budget: int) -> int:
    """Largest 128-multiple divisor of T whose per-step working set fits ~half the budget."""
    c_big = max(c_in, c_out)
    fixed = 4 * c_out * (3 * c_big + c_big)               # stacked conv weight + 1x1 proj (f32)
    best = None
    t = 128
    while t <= min(T, 16384):
        if T % t == 0:
            dbuf = 2 * (2 * c_big + c_out) * t * itemsize  # x, residual, out (double-buffered)
            temps = (6 * c_big + 2 * c_out) * t * 4        # f32 act / shifts / stack / acc
            if fixed + dbuf + temps <= vmem_budget // 2:
                best = t
        t += 128
    if best is not None:
        return best
    return 128 if T % 128 == 0 else T


# --------------------------------------------------------------------------- #
# Pass A: per-tile channel stats + tile edge columns of x                      #
# --------------------------------------------------------------------------- #
def _stats_edges_kernel(x_ref, stats_ref, edges_ref):
    # x_ref: (C, TILE_T).  stats_ref: (C, 2) f32 [sum, sumsq].  edges_ref: (C, 2) x-dtype.
    x = x_ref[...]
    xf = x.astype(jnp.float32)
    s = jnp.sum(xf, axis=-1, keepdims=True)
    ss = jnp.sum(xf * xf, axis=-1, keepdims=True)
    stats_ref[...] = jnp.concatenate([s, ss], axis=-1)
    edges_ref[...] = jnp.concatenate([x[:, :1], x[:, -1:]], axis=-1)


def _stats_pass(x, tile_t, vmem_limit):
    B, C, T = x.shape
    nT = T // tile_t
    return pl.pallas_call(
        _stats_edges_kernel,
        out_shape=(jax.ShapeDtypeStruct((B, nT, C, 2), jnp.float32),
                   jax.ShapeDtypeStruct((B, nT, C, 2), x.dtype)),
        grid_spec=pltpu.PrefetchScalarGridSpec(
            num_scalar_prefetch=0,
            grid=(B, nT),
            in_specs=[pl.BlockSpec((None, C, tile_t), lambda b, t: (b, 0, t))],
            out_specs=(pl.BlockSpec((None, None, C, 2), lambda b, t: (b, t, 0, 0)),
                       pl.BlockSpec((None, None, C, 2), lambda b, t: (b, t, 0, 0))),
        ),
        compiler_params=pltpu.CompilerParams(
            dimension_semantics=("parallel", "parallel"),
            vmem_limit_bytes=vmem_limit),
    )(x)


# --------------------------------------------------------------------------- #
# Pass B/C: fused affine -> SiLU -> Conv1d(k=3,p=1) [-> +residual] [-> aux]    #
# --------------------------------------------------------------------------- #
def _fused_block_kernel(x_ref, halo_ref, sb_ref, w_ref, cb_ref, *rest,
                        residual: str, emit_aux: bool):
    i = 0
    res_ref = rw_ref = None
    if residual != "none":
        res_ref = rest[i]; i += 1
    if residual == "project":
        rw_ref = rest[i]; i += 1
    o_ref = rest[i]; i += 1
    stats_ref = edges_ref = None
    if emit_aux:
        stats_ref, edges_ref = rest[i], rest[i + 1]

    t_idx = pl.program_id(1)
    n_t = pl.num_programs(1)

    scale = sb_ref[:, 0:1]                              # (C_in, 1) f32: folded GN (+scale_shift)
    bias = sb_ref[:, 1:2]                               # (C_in, 1) f32

    x = x_ref[...].astype(jnp.float32)                  # (C_in, TILE_T)
    act = jax.nn.silu(x * scale + bias)

    # Neighbour-tile edge columns; zeroed at the true sequence edges AFTER activation,
    # because Conv1d zero-pads its (activated) input.
    lh = jax.nn.silu(halo_ref[:, 0:1].astype(jnp.float32) * scale + bias)   # (C_in, 1)
    rh = jax.nn.silu(halo_ref[:, 1:2].astype(jnp.float32) * scale + bias)   # (C_in, 1)
    lh = jnp.where(t_idx > 0, lh, 0.0)
    rh = jnp.where(t_idx < n_t - 1, rh, 0.0)

    tile_t = act.shape[1]
    if tile_t % 128 == 0:
        # Lane-aligned tiles: shifts via XLU rotates + single-column selects (no lane concats).
        iota = lax.broadcasted_iota(jnp.int32, act.shape, 1)
        a_m1 = jnp.where(iota == 0, lh, pltpu.roll(act, 1, axis=1))
        a_p1 = jnp.where(iota == tile_t - 1, rh, pltpu.roll(act, tile_t - 1, axis=1))
    else:  # small / unaligned fallback tile
        a_m1 = jnp.concatenate([lh, act[:, :-1]], axis=1)
        a_p1 = jnp.concatenate([act[:, 1:], rh], axis=1)

    # All three conv taps in ONE MXU call: (C_out, 3*C_in) @ (3*C_in, TILE_T).
    a_stack = jnp.concatenate([a_m1, act, a_p1], axis=0).astype(w_ref.dtype)
    out = jnp.dot(w_ref[...], a_stack, preferred_element_type=jnp.float32)
    out += cb_ref[...]                                  # conv bias (+ folded 1x1-proj bias)

    if residual == "identity":
        out += res_ref[...].astype(jnp.float32)
    elif residual == "project":
        out += jnp.dot(rw_ref[...], res_ref[...].astype(rw_ref.dtype),
                       preferred_element_type=jnp.float32)

    out_q = out.astype(o_ref.dtype)
    o_ref[...] = out_q

    if emit_aux:
        # Partial GroupNorm stats + edge columns of this output tile (block2 reuses them,
        # so h never needs to be re-read from HBM just for its statistics / halos).
        hf = out_q.astype(jnp.float32)
        s = jnp.sum(hf, axis=-1, keepdims=True)
        ss = jnp.sum(hf * hf, axis=-1, keepdims=True)
        stats_ref[...] = jnp.concatenate([s, ss], axis=-1)
        edges_ref[...] = jnp.concatenate([out_q[:, :1], out_q[:, -1:]], axis=-1)


def _fused_conv_pass(x, halo, sb, conv_w, conv_b, *, residual=None, res_w=None, res_b=None,
                     tile_t, emit_aux, out_dtype=None, mxu_dtype=None, vmem_limit):
    B, C_in, T = x.shape
    C_out, c_in_w, K = conv_w.shape
    assert c_in_w == C_in and K == 3, "only kernel_size=3, stride=1, padding=1, dilation=1"
    assert T % tile_t == 0
    nT = T // tile_t
    out_dtype = out_dtype if out_dtype is not None else x.dtype
    mxu_dtype = mxu_dtype if mxu_dtype is not None else jnp.float32

    # Stacked conv weight (a_m1 | act | a_p1 ordering) + bias with the 1x1-proj bias folded in.
    wk = jnp.concatenate([conv_w[:, :, 0], conv_w[:, :, 1], conv_w[:, :, 2]],
                         axis=1).astype(mxu_dtype)                        # (C_out, 3*C_in)
    cb = conv_b.astype(jnp.float32)
    if residual is not None and res_w is not None and res_b is not None:
        cb = cb + res_b.astype(jnp.float32)
    cb = cb.reshape(C_out, 1)

    inputs = [x, halo, sb, wk, cb]
    in_specs = [
        pl.BlockSpec((None, C_in, tile_t), lambda b, t: (b, 0, t)),
        pl.BlockSpec((None, None, C_in, 2), lambda b, t: (b, t, 0, 0)),
        pl.BlockSpec((None, C_in, 2), lambda b, t: (b, 0, 0)),
        pl.BlockSpec((C_out, 3 * C_in), lambda b, t: (0, 0)),
        pl.BlockSpec((C_out, 1), lambda b, t: (0, 0)),
    ]

    if residual is None:
        res_mode = "none"
    else:
        Br, C_res, Tr = residual.shape
        assert Br == B and Tr == T
        inputs.append(residual)
        in_specs.append(pl.BlockSpec((None, C_res, tile_t), lambda b, t: (b, 0, t)))
        if res_w is None:
            assert C_res == C_out
            res_mode = "identity"
        else:
            res_mode = "project"
            rw = res_w.reshape(C_out, C_res).astype(mxu_dtype)
            inputs.append(rw)
            in_specs.append(pl.BlockSpec((C_out, C_res), lambda b, t: (0, 0)))

    out_shape = [jax.ShapeDtypeStruct((B, C_out, T), out_dtype)]
    out_specs = [pl.BlockSpec((None, C_out, tile_t), lambda b, t: (b, 0, t))]
    if emit_aux:
        out_shape += [jax.ShapeDtypeStruct((B, nT, C_out, 2), jnp.float32),
                      jax.ShapeDtypeStruct((B, nT, C_out, 2), out_dtype)]
        out_specs += [pl.BlockSpec((None, None, C_out, 2), lambda b, t: (b, t, 0, 0)),
                      pl.BlockSpec((None, None, C_out, 2), lambda b, t: (b, t, 0, 0))]

    kernel = functools.partial(_fused_block_kernel, residual=res_mode, emit_aux=emit_aux)
    result = pl.pallas_call(
        kernel,
        out_shape=tuple(out_shape),
        grid_spec=pltpu.PrefetchScalarGridSpec(
            num_scalar_prefetch=0,
            grid=(B, nT),
            in_specs=in_specs,
            out_specs=tuple(out_specs),
        ),
        compiler_params=pltpu.CompilerParams(
            dimension_semantics=("parallel", "parallel"),
            vmem_limit_bytes=vmem_limit),
    )(*inputs)
    if emit_aux:
        return result
    return (result[0] if isinstance(result, (tuple, list)) else result,)


# --------------------------------------------------------------------------- #
# Tiny wrapper-side math: GN fold and halo assembly (all on (B, nT, C, 2))     #
# --------------------------------------------------------------------------- #
def _fold_affine(stats, gamma, beta, *, num_groups, eps, T, use_norm, scale_shift, B, C):
    """Fold GroupNorm (from per-tile stats) and optional scale_shift into (B, C, 2)=[scale,bias]."""
    if use_norm:
        tot = stats.sum(axis=1)                                  # (B, C, 2)
        cpg = C // num_groups
        cnt = float(cpg * T)
        g = tot.reshape(B, num_groups, cpg, 2).sum(axis=2)       # (B, G, 2)
        mean = g[..., 0] / cnt
        var = jnp.maximum(g[..., 1] / cnt - mean * mean, 0.0)    # clamp (cancellation guard)
        rstd = lax.rsqrt(var + eps)
        mean_c = jnp.repeat(mean, cpg, axis=1)                   # (B, C)
        rstd_c = jnp.repeat(rstd, cpg, axis=1)
        a_scale = rstd_c * gamma.astype(jnp.float32)[None, :]
        a_bias = beta.astype(jnp.float32)[None, :] - mean_c * a_scale
    else:
        a_scale = jnp.ones((B, C), jnp.float32)
        a_bias = jnp.zeros((B, C), jnp.float32)
    if scale_shift is not None:
        s, sh = scale_shift
        s = s.astype(jnp.float32)
        sh = sh.astype(jnp.float32)
        a_bias = a_bias * (1.0 + s) + sh
        a_scale = a_scale * (1.0 + s)
    return jnp.stack([a_scale, a_bias], axis=-1)                 # (B, C, 2) f32


def _halo_from_edges(edges):
    """edges (B,nT,C,2)=[first,last col of tile] -> halo (B,nT,C,2)=[prev-last, next-first]."""
    left = jnp.pad(edges[:, :-1, :, 1:2], ((0, 0), (1, 0), (0, 0), (0, 0)))
    right = jnp.pad(edges[:, 1:, :, 0:1], ((0, 0), (0, 1), (0, 0), (0, 0)))
    return jnp.concatenate([left, right], axis=-1)


# --------------------------------------------------------------------------- #
# ResnetBlock1d forward                                                        #
# --------------------------------------------------------------------------- #
def resnet_block_1d(x, params, *, num_groups=8, eps=1e-5, mapping=None, use_norm=True,
                    intermediate_dtype=None, mxu_dtype=None, tile_t=None):
    """h = block1(x); h = block2(h, scale_shift(mapping)); return h + to_out(x).

    intermediate_dtype: storage dtype of h (None -> x.dtype; bf16 halves h HBM traffic).
    mxu_dtype: dtype of the MXU operands (None -> f32 exact; bf16 for 2-4x MXU throughput).
    """
    B, C_in, T = x.shape
    p1, p2 = params["block1"], params["block2"]
    C_out = p1["w"].shape[0]
    to_out = params.get("to_out")

    vmem_limit = _vmem_limit_bytes()
    if tile_t is None:
        tile_t = _choose_tile_t(T, C_in, C_out, x.dtype.itemsize, vmem_limit)
    assert T % tile_t == 0
    nT = T // tile_t
    h_dtype = intermediate_dtype if intermediate_dtype is not None else x.dtype

    # ---- pass A: stats of x (GroupNorm) + x edge columns (block1 conv halos) ----
    need_aux1 = use_norm or nT > 1
    if need_aux1:
        stats_x, edges_x = _stats_pass(x, tile_t, vmem_limit)
        halo1 = _halo_from_edges(edges_x)
    else:
        stats_x = None
        halo1 = jnp.zeros((B, nT, C_in, 2), x.dtype)
    sb1 = _fold_affine(stats_x, p1["gn_g"], p1["gn_b"], num_groups=num_groups, eps=eps,
                       T=T, use_norm=use_norm, scale_shift=None, B=B, C=C_in)

    # ---- pass B: block1 fused; also emits block2's stats + h edge columns ----
    need_aux2 = use_norm or nT > 1
    res_b1 = _fused_conv_pass(x, halo1, sb1, p1["w"], p1["b"],
                              tile_t=tile_t, emit_aux=need_aux2, out_dtype=h_dtype,
                              mxu_dtype=mxu_dtype, vmem_limit=vmem_limit)
    if need_aux2:
        h, stats_h, edges_h = res_b1
        halo2 = _halo_from_edges(edges_h)
    else:
        (h,) = res_b1
        stats_h = None
        halo2 = jnp.zeros((B, nT, C_out, 2), h.dtype)

    # ---- MappingToScaleShift: SiLU -> Linear -> chunk (tiny wrapper matmul, folded) ----
    scale_shift = None
    if mapping is not None:
        mp = params["mapping"]
        ss = (jax.nn.silu(mapping.astype(jnp.float32)) @ mp["w"].T.astype(jnp.float32)
              + mp["b"].astype(jnp.float32))
        s, sh = jnp.split(ss, 2, axis=-1)
        scale_shift = (s, sh)

    sb2 = _fold_affine(stats_h, p2["gn_g"], p2["gn_b"], num_groups=num_groups, eps=eps,
                       T=T, use_norm=use_norm, scale_shift=scale_shift, B=B, C=C_out)

    # ---- pass C: block2 fused + residual add (identity or fused 1x1 projection) ----
    (out,) = _fused_conv_pass(h, halo2, sb2, p2["w"], p2["b"],
                              residual=x,
                              res_w=None if to_out is None else to_out["w"],
                              res_b=None if to_out is None else to_out["b"],
                              tile_t=tile_t, emit_aux=False, out_dtype=x.dtype,
                              mxu_dtype=mxu_dtype, vmem_limit=vmem_limit)
    return out
    # TODO(synk): cross-attention context path (use_embedding / CrossAttention) not implemented.


# --------------------------------------------------------------------------- #
# Pure-JAX reference (matches the PyTorch forward)                             #
# --------------------------------------------------------------------------- #
def _conv1d_ref(x, w, b, padding):
    out = lax.conv_general_dilated(
        x.astype(jnp.float32), w.astype(jnp.float32),
        window_strides=(1,), padding=[(padding, padding)],
        dimension_numbers=("NCH", "OIH", "NCH"),
        precision=lax.Precision.HIGHEST)
    return out + b.astype(jnp.float32)[None, :, None]


def _group_norm_ref(x, gamma, beta, num_groups, eps):
    B, C, T = x.shape
    xg = x.reshape(B, num_groups, C // num_groups, T).astype(jnp.float32)
    mean = xg.mean(axis=(2, 3), keepdims=True)
    var = ((xg - mean) ** 2).mean(axis=(2, 3), keepdims=True)
    xn = ((xg - mean) * lax.rsqrt(var + eps)).reshape(B, C, T)
    return xn * gamma[None, :, None] + beta[None, :, None]


def _conv_block_ref(x, gn_g, gn_b, w, b, *, num_groups, eps, scale_shift=None):
    h = _group_norm_ref(x, gn_g, gn_b, num_groups, eps)
    if scale_shift is not None:
        s, sh = scale_shift
        h = h * (s[:, :, None] + 1.0) + sh[:, :, None]
    h = jax.nn.silu(h)
    return _conv1d_ref(h, w, b, padding=1)


def resnet_block_1d_ref(x, params, *, num_groups=8, eps=1e-5, mapping=None):
    p1 = params["block1"]
    h = _conv_block_ref(x, p1["gn_g"], p1["gn_b"], p1["w"], p1["b"],
                        num_groups=num_groups, eps=eps)
    scale_shift = None
    if mapping is not None:
        mp = params["mapping"]
        ss = jax.nn.silu(mapping) @ mp["w"].T + mp["b"]
        s, sh = jnp.split(ss, 2, axis=-1)
        scale_shift = (s, sh)
    p2 = params["block2"]
    h2 = _conv_block_ref(h, p2["gn_g"], p2["gn_b"], p2["w"], p2["b"],
                         num_groups=num_groups, eps=eps, scale_shift=scale_shift)
    to_out = params.get("to_out")
    res = x if to_out is None else _conv1d_ref(x, to_out["w"], to_out["b"], padding=0)
    return h2 + res


# --------------------------------------------------------------------------- #
# Demo / correctness check                                                     #
# --------------------------------------------------------------------------- #
if __name__ == "__main__":
    key = jax.random.PRNGKey(0)
    B, C_in, C_out, T = 2, 8, 16, 16
    num_groups = 8
    ctx_feats = 32

    ks = jax.random.split(key, 13)
    x = jax.random.normal(ks[0], (B, C_in, T), jnp.float32)
    mapping = jax.random.normal(ks[1], (B, ctx_feats), jnp.float32)

    def unif(k, shape, scale):
        return jax.random.uniform(k, shape, jnp.float32, -scale, scale)

    params = {
        "block1": {
            "gn_g": 1.0 + 0.1 * jax.random.normal(ks[2], (C_in,), jnp.float32),
            "gn_b": 0.1 * jax.random.normal(ks[3], (C_in,), jnp.float32),
            "w": unif(ks[4], (C_out, C_in, 3), 1.0 / (C_in * 3) ** 0.5),
            "b": unif(ks[5], (C_out,), 1.0 / (C_in * 3) ** 0.5),
        },
        "block2": {
            "gn_g": 1.0 + 0.1 * jax.random.normal(ks[6], (C_out,), jnp.float32),
            "gn_b": 0.1 * jax.random.normal(ks[7], (C_out,), jnp.float32),
            "w": unif(ks[8], (C_out, C_out, 3), 1.0 / (C_out * 3) ** 0.5),
            "b": unif(ks[9], (C_out,), 1.0 / (C_out * 3) ** 0.5),
        },
        "mapping": {
            "w": unif(ks[10], (2 * C_out, ctx_feats), 1.0 / ctx_feats ** 0.5),
            "b": jnp.zeros((2 * C_out,), jnp.float32),
        },
        "to_out": {  # in_channels != out_channels -> 1x1 conv residual projection
            "w": unif(ks[11], (C_out, C_in, 1), 1.0 / C_in ** 0.5),
            "b": jnp.zeros((C_out,), jnp.float32),
        },
    }

    # --- small shape (whole-T fallback path) ---
    out = resnet_block_1d(x, params, num_groups=num_groups, mapping=mapping)
    out = jax.block_until_ready(out)
    ref = resnet_block_1d_ref(x, params, num_groups=num_groups, mapping=mapping)
    assert out.shape == (B, C_out, T)
    err = float(jnp.max(jnp.abs(out - ref)))
    assert bool(jnp.allclose(out, ref, atol=1e-2, rtol=1e-2)), f"mismatch (small): {err}"

    # --- lane-aligned tiled path (multi-tile halos, rolls, fused stats) ---
    T2 = 256
    x2 = jax.random.normal(ks[12], (B, C_in, T2), jnp.float32)
    out2 = resnet_block_1d(x2, params, num_groups=num_groups, mapping=mapping, tile_t=128)
    out2 = jax.block_until_ready(out2)
    ref2 = resnet_block_1d_ref(x2, params, num_groups=num_groups, mapping=mapping)
    err2 = float(jnp.max(jnp.abs(out2 - ref2)))
    assert bool(jnp.allclose(out2, ref2, atol=1e-2, rtol=1e-2)), f"mismatch (tiled): {err2}"

    print("KERNEL_OK")
</pallas_src>

<mosaic_0001>
module attributes {stable_mosaic.version = 11 : i64} {
  func.func @_stats_edges_kernel(%arg0: i32, %arg1: i32, %arg2: memref<1x8x16xf32, #tpu.memory_space<vmem>>, %arg3: memref<1x1x8x2xf32, #tpu.memory_space<vmem>>, %arg4: memref<1x1x8x2xf32, #tpu.memory_space<vmem>>) attributes {dimension_semantics = [#tpu.dimension_semantics<parallel>, #tpu.dimension_semantics<parallel>], iteration_bounds = array<i64: 2, 1>, scalar_prefetch = 0 : i64, scratch_operands = 0 : i64, tpu.core_type = #tpu.core_type<tc>, window_params = [{transform_indices = @transform_0, window_bounds = array<i64: 1, 8, 16>}, {transform_indices = @transform_1, window_bounds = array<i64: 1, 1, 8, 2>}, {transform_indices = @transform_2, window_bounds = array<i64: 1, 1, 8, 2>}]} {
    %c0 = arith.constant 0 : index
    %c0_0 = arith.constant 0 : index
    %c0_1 = arith.constant 0 : index
    %0 = vector.load %arg2[%c0, %c0_0, %c0_1] : memref<1x8x16xf32, #tpu.memory_space<vmem>>, vector<1x8x16xf32>
    %1 = vector.shape_cast %0 : vector<1x8x16xf32> to vector<8x16xf32>
    %cst = arith.constant dense<0.000000e+00> : vector<8xf32>
    %2 = vector.multi_reduction <add>, %1, %cst [1] : vector<8x16xf32> to vector<8xf32>
    %3 = vector.shape_cast %2 : vector<8xf32> to vector<8x1xf32>
    %4 = arith.mulf %1, %1 : vector<8x16xf32>
    %cst_2 = arith.constant dense<0.000000e+00> : vector<8xf32>
    %5 = vector.multi_reduction <add>, %4, %cst_2 [1] : vector<8x16xf32> to vector<8xf32>
    %6 = vector.shape_cast %5 : vector<8xf32> to vector<8x1xf32>
    %7 = tpu.concatenate %3, %6 in 1 : vector<8x1xf32>, vector<8x1xf32> -> vector<8x2xf32>
    %c0_3 = arith.constant 0 : index
    %c0_4 = arith.constant 0 : index
    %c0_5 = arith.constant 0 : index
    %c0_6 = arith.constant 0 : index
    %8 = vector.load %arg3[%c0_3, %c0_4, %c0_5, %c0_6] : memref<1x1x8x2xf32, #tpu.memory_space<vmem>>, vector<1x1x8x2xf32>
    %9 = vector.shape_cast %8 : vector<1x1x8x2xf32> to vector<8x2xf32>
    %10 = vector.shape_cast %7 : vector<8x2xf32> to vector<1x1x8x2xf32>
    tpu.vector_store %arg3[%c0_3, %c0_4, %c0_5, %c0_6], %10 {strides = array<i32>} : memref<1x1x8x2xf32, #tpu.memory_space<vmem>>, vector<1x1x8x2xf32>,
    %11 = vector.extract_strided_slice %1 {offsets = [0, 0], sizes = [8, 1], strides = [1, 1]} : vector<8x16xf32> to vector<8x1xf32>
    %12 = vector.extract_strided_slice %1 {offsets = [0, 15], sizes = [8, 1], strides = [1, 1]} : vector<8x16xf32> to vector<8x1xf32>
    %13 = tpu.concatenate %11, %12 in 1 : vector<8x1xf32>, vector<8x1xf32> -> vector<8x2xf32>
    %c0_7 = arith.constant 0 : index
    %c0_8 = arith.constant 0 : index
    %c0_9 = arith.constant 0 : index
    %c0_10 = arith.constant 0 : index
    %14 = vector.load %arg4[%c0_7, %c0_8, %c0_9, %c0_10] : memref<1x1x8x2xf32, #tpu.memory_space<vmem>>, vector<1x1x8x2xf32>
    %15 = vector.shape_cast %14 : vector<1x1x8x2xf32> to vector<8x2xf32>
    %16 = vector.shape_cast %13 : vector<8x2xf32> to vector<1x1x8x2xf32>
    tpu.vector_store %arg4[%c0_7, %c0_8, %c0_9, %c0_10], %16 {strides = array<i32>} : memref<1x1x8x2xf32, #tpu.memory_space<vmem>>, vector<1x1x8x2xf32>,
    return
  }
  func.func @transform_0(%arg0: i32, %arg1: i32) -> (i32, i32, i32) {
    %c0_i32 = arith.constant 0 : i32
    %c0_i32_0 = arith.constant 0 : i32
    return %arg0, %c0_i32, %arg1 : i32, i32, i32
  }
  func.func @transform_1(%arg0: i32, %arg1: i32) -> (i32, i32, i32, i32) {
    %c0_i32 = arith.constant 0 : i32
    %c0_i32_0 = arith.constant 0 : i32
    %c0_i32_1 = arith.constant 0 : i32
    return %arg0, %arg1, %c0_i32, %c0_i32_0 : i32, i32, i32, i32
  }
  func.func @transform_2(%arg0: i32, %arg1: i32) -> (i32, i32, i32, i32) {
    %c0_i32 = arith.constant 0 : i32
    %c0_i32_0 = arith.constant 0 : i32
    %c0_i32_1 = arith.constant 0 : i32
    return %arg0, %arg1, %c0_i32, %c0_i32_0 : i32, i32, i32, i32
  }
}

</mosaic_0001>

<bundles_post_ra>
// kernel: tpu_custom_call.1
= control target key start
LH: loop header
LB: loop body
LE: loop exit
PB: predicated region body
PF: predicated region fallthrough
CT: control target
= control target key end

     0   :  { %8 = vsyncpa [#allocation3], 0  ;;  %s640_s0 = inlined_call_operand.hbm [shape: f32[2,8,16], index: 0, kind: input, shape index: {}]   ;;  %s641_s1 = inlined_call_operand.vmem [shape: f32[2,1,8,2], index: 1, kind: output, shape index: {0}]   ;;  %s642_s2 = inlined_call_operand.vmem [shape: f32[2,1,8,2], index: 2, kind: output, shape index: {1}]  }
   0x1   :  { %10 = vsyncpa [#allocation3 + $0x1], 0  ;;  %s512_s9 = smov 0   ;;  %s514_s10 = smov 0  }
   0x2   :  { %s516_s11 = smov 0   ;;  %s518_s12 = smov 0  }
   0x3   :  { %s520_s13 = smov 0   ;;  %s522_s14 = smov 0  }
   0x4 LB: > { %s345_s15 = sadd.s32 4294967295, %s493_s14   ;;  %s28_s16 = sadd.s32 1, %s489_s13  ;;  %s493_s14 = sphi %s522_s14, %s16_s14   ;;  %s489_s13 = sphi %s520_s13, %s652_s13   ;;  %s485_s12 = sphi %s518_s12, %s651_s12   ;;  %s481_s11 = sphi %s516_s11, %s650_s11   ;;  %s477_s10 = sphi %s514_s10, %s649_s10   ;;  %s473_s9 = sphi %s512_s9, %s648_s9  }
   0x5   : > { %p30_p0 = scmp.ge.s32.totalorder %s28_s16, 2  ;;  %s37_s17 = sadd.s32 1, %s481_s11 }
   0x6   : > { %p44_p1 = scmp.ne.s32.totalorder %s481_s11, %s477_s10  ;;  %p45_p2 = scmp.eq.s32.totalorder %s493_s14, 0 }
   0x7   : > { %s654_s16 = smov (%p30_p0, %s28_s16), 0  ;;  %p50_p4 = scmp.ne.s32.totalorder %s477_s10, %s473_s9 }
   0x8   : > { %p548_p3 = por %p45_p2, %p44_p1  ;;  %s32_s19 = ssub.s32 %s489_s13, %s654_s16 }
   0x9   : > { %p51_p5 = scmp.eq.s32.totalorder %s345_s15, 0  ;;  %p35_p6 = scmp.eq.s32.totalorder %s32_s19, 0 }
   0xa   : > { %p363_p8 = scmp.lt.s32.totalorder %s493_s14, 2  ;;  %s130_s22 = sand.u32 1, %s481_s11  }
   0xb   : > { %p555_p7 = por %p51_p5, %p50_p4  ;;  %s350_s23 = sshll.u32 %s489_s13, 7 }
   0xc   : > { %s561_s21 = scalar_select %p35_p6, %s481_s11, %s37_s17  }
   0xd   : > { %s349_s24 = sshll.u32 %s130_s22, 3  ;;  %s568_s27 = scalar_lea.hbm %s640_s0, %s350_s23 }
   0xe   : > { %s134_s28 = scalar_lea.vmem [#allocation2], %s349_s24  ;;  %p572_p9 = pnand %p363_p8, %p548_p3 }
   0xf   : > { %s142_s29 = sshll.u32 %s134_s28, 4  ;;  %s131_s3 = scalar_lea.sflag [#allocation3], %s130_s22  ;;  %s576_s29 = int_to_ptr.vmem [resolvable:$true] %s142_s29 }
  0x10   : > { %s413_s4 = scalar_lea.hbm %s568_s27, 128  ;;  %p415_p13 = pneg %p572_p9 }
  0x11   : > { %p414_p12 = scmp.ne.s32.totalorder %s568_s27, %s413_s4  ;;  %s418_s7 = scalar_lea.hbm %s640_s0, 256 }
  0x12   : > { %p419_p2 = scmp.lt.u32.totalorder %s568_s27, %s640_s0  ;;  %p420_p3 = scmp.lt.u32.totalorder %s418_s7, %s413_s4 }
  0x13   : > { %p416_p0 = pnand %p415_p13, %p414_p12  ;;  %p422_p5 = scmp.lt.u32.totalorder %s413_s4, %s568_s27 }
  0x14   : > { %p421_p4 = por %p420_p3, %p419_p2 }
  0x15   : > { %p417_p1 = pneg %p416_p0 }
  0x16   : > { %p423_p6 = por %p422_p5, %p421_p4 }
  0x18   : > { %p424_p8 = pnand %p423_p6, %p417_p1 }
  0x1a   : > { %427 = shalt.err (!%p424_p8)
}
  0x1b   : > { %s428_s15 = scalar_lea.vmem %s576_s29, 128  ;;  %s495_s17 = smov [#allocation2]  }
  0x1c   : > { %p429_p12 = scmp.ne.s32.totalorder %s576_s29, %s428_s15  ;;  %s433_s18 = sshll.u32 %s495_s17, 4  ;;  %s434_s18 = int_to_ptr.vmem [resolvable:$false] %s433_s18 }
  0x1d   : > { %s435_s19 = scalar_lea.vmem %s434_s18, 256  ;;  %p436_p11 = scmp.lt.s32.totalorder %s576_s29, %s434_s18 }
  0x1e   : > { %p431_p0 = pnand %p429_p12, %p415_p13  ;;  %p437_p2 = scmp.lt.s32.totalorder %s435_s19, %s428_s15 }
  0x20   : > { %p432_p10 = pneg %p431_p0  ;;  %p438_p3 = por %p437_p2, %p436_p11 }
  0x22   : > { %p439_p4 = pnand %p438_p3, %p432_p10 }
  0x24   : > { %442 = shalt.err (!%p439_p4)
}
  0x25   : > { %362 = dma.hbm_to_vmem [thread:$0]  (!%p572_p9), %s568_s27, 128, %s576_s29, %s131_s3  }
  0x26   : > { %p646_p1 = scmp.lt.s32.totalorder %s493_s14, 3  ;;  %p647_p5 = scmp.ge.s32.totalorder %s493_s14, 1 }
  0x28   : > { %p148_p13 = pnand %p647_p5, %p646_p1 }
  0x29   : > { %s153_s22 = sand.u32 (!%p148_p13), 1, %s477_s10  }
  0x2a   : > { %151 = sbr.rel (%p148_p13) target bundleno = 200 (0xc8), region = 24  ;;  %s352_s23 = sshll.u32 (!%p148_p13), %s153_s22, 3 }
  0x2b   : > { %s154_s24 = scalar_lea.sflag (!%p148_p13), [#allocation3], %s153_s22  ;;  %s157_s25 = scalar_lea.vmem (!%p148_p13), [#allocation2], %s352_s23 }
  0x31   : > { %468 = dma.done.wait (%p555_p7), %s154_s24, 128  }
  0x32   : > { %470 = vsyncadd (%p555_p7), %s154_s24, 4294967168  ;;  %vm202_vm0 = vcmask 130048   ;;  %v201_v0 = vld [vmem:[%s157_s25] sm:$0xff]  ;;  %s496_s26 = smov 114   ;;  %p187_p9 = scmp.lt.s32.totalorder %s485_s12, 1  ;;  %vm210_vm1 = vcmask 7168  }
  0x33   : > { %v203_v1 = vsel %vm202_vm0, %v201_v0, 0.0  ;;  %v206_v2 = vmul.f32 %v201_v0, %v201_v0  ;;  %215 = vrot.lane.b32.xlu1 %v201_v0, %s496_s26  ;;  %vm212_vm2 = vcmask 15360  }
  0x34   : > { %204 = vadd.xlane.f32.xlu0 %v203_v1  ;;  %s656_s12 = smov (!%p187_p9, %s485_s12), 1 }
  0x35   : > { %v207_v3 = vsel %vm202_vm0, %v206_v2, 0.0  ;;  %s353_s27 = sshll.u32 %s656_s12, 3 }
  0x36   : > { %s200_s20 = scalar_lea.vmem %s642_s2, %s353_s27  ;;  %s193_s4 = scalar_lea.vmem %s641_s1, %s353_s27 }
  0x38   : > { %208 = vadd.xlane.f32.xlu0 %v207_v3 }
  0xa5   : > { %v216_v4 = vpop.permute.xlu1 %215 }
  0xa6   : > { %v218_v5 = vsel %vm210_vm1, %v201_v0, %v216_v4 }
  0xa7   : > { %219 = vst.msk [vmem:[%s200_s20] sm:$0xff] %vm212_vm2, %v218_v5 }
  0xc1   : > { %v205_v6 = vpop.xlane.xlu0 %204 }
  0xc5   : > { %v209_v7 = vpop.xlane.xlu0 %208 }
  0xc6   : > { %v211_v8 = vsel %vm210_vm1, %v205_v6, %v209_v7 }
  0xc7   : > { %213 = vst.msk [vmem:[%s193_s4] sm:$0xff] %vm212_vm2, %v211_v8 }
  0xc8 PF: > { %s16_s14 = sadd.s32 1, %s493_s14   ;;  %s648_s9 = smov %s477_s10 }
  0xc9   : > { %p13_p7 = scmp.ge.s32.totalorder %s16_s14, 4   ;;  %s649_s10 = smov %s481_s11 }
  0xca   : > { %s650_s11 = smov %s561_s21  ;;  %s651_s12 = smov %s489_s13 }
  0xcb   : > { %s652_s13 = smov %s654_s16  ;;  %15 = sbr.rel (!%p13_p7) target bundleno = 4 (0x4), region = 76 }
  0xd2   :  { %265 = vsyncpa [#allocation3], 1 }
  0xd3   :  { %267 = vsyncpa [#allocation3 + $0x1], 1 }

</bundles_post_ra>
